<compile_context>
chip_gen: v7x
topology: tpu7x:2x2x1
jax: 0.10.0
libtpu: 0.0.40
codegen_flags: <defaults>
</compile_context>

<pallas_src>
import functools

import numpy as np

import jax
import jax.numpy as jnp
from jax.experimental import pallas as pl
from jax.experimental.pallas import tpu as pltpu


def _round_up(x, m):
    return ((x + m - 1) // m) * m


def _default_tile_m():
    """256 rows on 256-wide MXU chips (v6e/v7x), 128 on 128-wide MXU chips."""
    try:
        kind = jax.devices()[0].device_kind.lower()
    except Exception:  # pragma: no cover - defensive
        return 256
    if any(tag in kind for tag in ("v5 lite", "v5e", "v5lite", "v4", "v3", "v2")):
        return 128
    return 256


# -----------------------------------------------------------------------------
# Pallas kernel
# -----------------------------------------------------------------------------


def _length_regulator_kernel(ks_ref, cs_lo_ref, cs_hi_ref, x_lo_ref, x_hi_ref, o_ref):
    """One (batch, frame-tile) grid point.

    ks_ref:    SMEM scalar-prefetch (flat [B*M] token-block starts); only used
               by the index_maps, not read here.
    cs_*_ref:  (2, tile_t) int32 — row 0 exclusive cumsum, row 1 inclusive
               cumsum of the compacted durations, for token window lo / hi.
    x_*_ref:   (tile_t, D_pad) token features for token window lo / hi.
    o_ref:     (tile_m, D_pad) output frames [m*tile_m, (m+1)*tile_m).
    """
    del ks_ref  # consumed by index_maps only
    tile_m = o_ref.shape[0]
    mi = pl.program_id(1)

    # Global frame indices covered by this output tile: (tile_m, 1).
    frames = mi * tile_m + jax.lax.broadcasted_iota(jnp.int32, (tile_m, 1), 0)

    def window_contrib(cs_ref, x_ref):
        cs = cs_ref[...]                 # (2, tile_t) int32 (global cumsums)
        cs_ex = cs[0:1, :]               # (1, tile_t)
        cs_in = cs[1:2, :]               # (1, tile_t)
        # onehot[j, i] == 1 iff frame j is produced by token i of this window.
        onehot = jnp.logical_and(frames >= cs_ex, frames < cs_in).astype(x_ref.dtype)
        return jnp.dot(onehot, x_ref[...], preferred_element_type=jnp.float32)

    # Each output frame row is produced by exactly one token, so the two window
    # contributions have disjoint non-zero rows and their sum is exact.
    acc = window_contrib(cs_lo_ref, x_lo_ref) + window_contrib(cs_hi_ref, x_hi_ref)
    o_ref[...] = acc.astype(o_ref.dtype)


# -----------------------------------------------------------------------------
# Wrapper
# -----------------------------------------------------------------------------


def length_regulator(x, duration, max_len, *, tile_m=None):
    """JAX/Pallas equivalent of LengthRegulator.forward.

    x:        [B, T, D] float token features
    duration: [B, T]    integer durations
    max_len:  static int (or None, eager-only)
    returns (output [B, max_len, D], mel_len [B] int32)
    """
    b, t, d = x.shape

    dur = jnp.maximum(duration.astype(jnp.int32), 0)          # clamp like expand()
    mel_len = jnp.sum(dur, axis=-1).astype(jnp.int32)          # [B]

    if max_len is None:
        # Eager-only path (data-dependent output length, matches `pad(output)`).
        m = jnp.max(mel_len)
        try:
            max_len = int(jax.device_get(m))
        except (jax.errors.ConcretizationTypeError,
                jax.errors.TracerIntegerConversionError) as e:
            raise ValueError(
                "length_regulator(max_len=None) requires eager execution; pass a "
                "static max_len under jit.") from e

    # ---- tile selection ------------------------------------------------------
    if tile_m is None:
        tile_m = _default_tile_m()
    tile_m = min(tile_m, max(8, _round_up(max_len, 8)))
    tile_m = _round_up(tile_m, 8)
    # Token window block; must be a lane multiple and >= tile_m so that the
    # (<= tile_m)-token contributing span always fits in two adjacent blocks.
    tile_t = _round_up(max(tile_m, 128), 128)
    m_tiles = pl.cdiv(max_len, tile_m)

    # ---- compact zero-duration tokens (stable) -------------------------------
    # All surviving tokens have duration >= 1, so <= tile_m tokens can
    # contribute to any tile_m-frame output tile.
    order = jnp.argsort((dur == 0).astype(jnp.int32), axis=-1, stable=True)   # [B, T]
    dur_c = jnp.take_along_axis(dur, order, axis=-1)
    x_c = jnp.take_along_axis(x, order[:, :, None], axis=1)

    cs_in = jnp.cumsum(dur_c, axis=-1).astype(jnp.int32)       # inclusive cumsum
    cs_ex = cs_in - dur_c                                       # exclusive cumsum

    # ---- per-(batch, frame-tile) token window start (scalar prefetch) --------
    f0 = jnp.arange(m_tiles, dtype=jnp.int32) * tile_m          # first frame of tile
    start = jax.vmap(
        lambda row: jnp.searchsorted(row, f0, side="right"))(cs_in).astype(jnp.int32)

    n_tok_blocks = pl.cdiv(t, tile_t) + 1                       # always >= 2
    t_pad = n_tok_blocks * tile_t
    # Clamp so kstart+1 is always a valid block (only bites when the window is
    # empty anyway, i.e. the whole tile is past the expanded length).
    kstart = jnp.clip(start // tile_t, 0, n_tok_blocks - 2).astype(jnp.int32)
    kstart_flat = kstart.reshape(-1)                            # [B * m_tiles]

    # ---- pad token dim (empty intervals) and feature dim (lane-dense) --------
    total = cs_in[:, -1:]                                       # [B, 1]
    pad_t = t_pad - t
    cs_in_p = jnp.concatenate([cs_in, jnp.broadcast_to(total, (b, pad_t))], axis=-1)
    cs_ex_p = jnp.concatenate([cs_ex, jnp.broadcast_to(total, (b, pad_t))], axis=-1)
    cs = jnp.stack([cs_ex_p, cs_in_p], axis=1)                  # [B, 2, t_pad] int32

    d_pad = _round_up(d, 128)
    x_p = jnp.pad(x_c, ((0, 0), (0, pad_t), (0, d_pad - d)))    # [B, t_pad, d_pad]

    # ---- pallas call ----------------------------------------------------------
    itemsize = jnp.dtype(x.dtype).itemsize
    cost = pl.CostEstimate(
        flops=2 * b * m_tiles * tile_m * (2 * tile_t) * d_pad,
        transcendentals=0,
        bytes_accessed=(b * m_tiles * 2 * tile_t * d_pad + b * max_len * d_pad) * itemsize
        + b * m_tiles * 2 * 2 * tile_t * 4,
    )

    out = pl.pallas_call(
        _length_regulator_kernel,
        out_shape=jax.ShapeDtypeStruct((b, max_len, d_pad), x.dtype),
        grid_spec=pltpu.PrefetchScalarGridSpec(
            num_scalar_prefetch=1,
            grid=(b, m_tiles),
            in_specs=[
                # cumsum windows (lo / hi token block)
                pl.BlockSpec((None, 2, tile_t),
                             lambda bi, mi, ks: (bi, 0, ks[bi * m_tiles + mi])),
                pl.BlockSpec((None, 2, tile_t),
                             lambda bi, mi, ks: (bi, 0, ks[bi * m_tiles + mi] + 1)),
                # feature windows (lo / hi token block)
                pl.BlockSpec((None, tile_t, d_pad),
                             lambda bi, mi, ks: (bi, ks[bi * m_tiles + mi], 0)),
                pl.BlockSpec((None, tile_t, d_pad),
                             lambda bi, mi, ks: (bi, ks[bi * m_tiles + mi] + 1, 0)),
            ],
            out_specs=pl.BlockSpec((None, tile_m, d_pad),
                                   lambda bi, mi, ks: (bi, mi, 0)),
        ),
        compiler_params=pltpu.CompilerParams(
            dimension_semantics=("parallel", "parallel"),
            vmem_limit_bytes=64 * 1024 * 1024,
        ),
        cost_estimate=cost,
    )(kstart_flat, cs, cs, x_p, x_p)

    if d_pad != d:
        # Only needed for non-lane-aligned feature dims; when D % 128 == 0 the
        # kernel output is returned directly with no extra HBM copy.
        out = out[..., :d]
    return out, mel_len


# -----------------------------------------------------------------------------
# Reference (mirrors the PyTorch LR/expand/pad logic) for verification
# -----------------------------------------------------------------------------


def _numpy_reference(x, duration, max_len):
    x = np.asarray(x)
    duration = np.asarray(duration)
    bsz, _, dim = x.shape
    out = np.zeros((bsz, max_len, dim), dtype=x.dtype)
    mel_len = []
    for bi in range(bsz):
        reps = np.maximum(duration[bi], 0)
        expanded = np.repeat(x[bi], reps, axis=0)
        length = expanded.shape[0]
        mel_len.append(length)
        out[bi, : min(length, max_len)] = expanded[:max_len]
    return out, np.asarray(mel_len, dtype=np.int32)


# -----------------------------------------------------------------------------
# Main
# -----------------------------------------------------------------------------

if __name__ == "__main__":
    def run_case(key, B, T, D, max_len, dur_hi):
        k_x, k_d = jax.random.split(key)
        x = jax.random.normal(k_x, (B, T, D), jnp.float32)
        duration = jax.random.randint(k_d, (B, T), 0, dur_hi, dtype=jnp.int32)

        fwd = jax.jit(functools.partial(length_regulator, max_len=max_len))
        out, mel_len = jax.block_until_ready(fwd(x, duration))

        ref_out, ref_mel = _numpy_reference(x, duration, max_len)
        assert out.shape == (B, max_len, D), out.shape
        assert mel_len.shape == (B,), mel_len.shape
        np.testing.assert_array_equal(np.asarray(mel_len), ref_mel)
        np.testing.assert_allclose(np.asarray(out), ref_out, rtol=1e-6, atol=1e-6)
        assert bool(jnp.all(jnp.isfinite(out)))

    root = jax.random.PRNGKey(0)
    k1, k2 = jax.random.split(root)
    # Small non-lane-aligned D with zero durations (exercises compaction + D pad).
    run_case(k1, B=2, T=8, D=32, max_len=32, dur_hi=5)
    # Lane-aligned D, max_len not a multiple of tile_m (partial masked output
    # tile), and total duration possibly exceeding max_len (truncation).
    run_case(k2, B=2, T=12, D=128, max_len=45, dur_hi=6)

    print("KERNEL_OK")
</pallas_src>

<mosaic_0001>
module attributes {stable_mosaic.version = 11 : i64} {
  func.func @_length_regulator_kernel(%arg0: i32, %arg1: i32, %arg2: memref<2xi32, #tpu.memory_space<smem>>, %arg3: memref<1x2x128xi32, #tpu.memory_space<vmem>>, %arg4: memref<1x2x128xi32, #tpu.memory_space<vmem>>, %arg5: memref<1x128x128xf32, #tpu.memory_space<vmem>>, %arg6: memref<1x128x128xf32, #tpu.memory_space<vmem>>, %arg7: memref<1x32x128xf32, #tpu.memory_space<vmem>>) attributes {dimension_semantics = [#tpu.dimension_semantics<parallel>, #tpu.dimension_semantics<parallel>], iteration_bounds = array<i64: 2, 1>, scalar_prefetch = 1 : i64, scratch_operands = 0 : i64, tpu.core_type = #tpu.core_type<tc>, window_params = [{transform_indices = @transform_0, window_bounds = array<i64: 1, 2, 128>}, {transform_indices = @transform_1, window_bounds = array<i64: 1, 2, 128>}, {transform_indices = @transform_2, window_bounds = array<i64: 1, 128, 128>}, {transform_indices = @transform_3, window_bounds = array<i64: 1, 128, 128>}, {transform_indices = @transform_4, window_bounds = array<i64: 1, 32, 128>}]} {
    %c32_i32 = arith.constant 32 : i32
    %0 = arith.muli %arg1, %c32_i32 : i32
    %1 = tpu.iota {dimensions = array<i32: 0>} : vector<32x1xi32>
    %2 = vector.broadcast %0 : i32 to vector<32x1xi32>
    %3 = arith.addi %2, %1 : vector<32x1xi32>
    %c0 = arith.constant 0 : index
    %c0_0 = arith.constant 0 : index
    %c0_1 = arith.constant 0 : index
    %4 = vector.load %arg3[%c0, %c0_0, %c0_1] : memref<1x2x128xi32, #tpu.memory_space<vmem>>, vector<1x2x128xi32>
    %5 = vector.shape_cast %4 : vector<1x2x128xi32> to vector<2x128xi32>
    %6 = vector.extract_strided_slice %5 {offsets = [0, 0], sizes = [1, 128], strides = [1, 1]} : vector<2x128xi32> to vector<1x128xi32>
    %7 = vector.extract_strided_slice %5 {offsets = [1, 0], sizes = [1, 128], strides = [1, 1]} : vector<2x128xi32> to vector<1x128xi32>
    %8 = vector.broadcast %3 : vector<32x1xi32> to vector<32x128xi32>
    %9 = vector.broadcast %6 : vector<1x128xi32> to vector<32x128xi32>
    %10 = arith.cmpi sge, %8, %9 : vector<32x128xi32>
    %11 = vector.broadcast %3 : vector<32x1xi32> to vector<32x128xi32>
    %12 = vector.broadcast %7 : vector<1x128xi32> to vector<32x128xi32>
    %13 = arith.cmpi slt, %11, %12 : vector<32x128xi32>
    %14 = arith.andi %10, %13 : vector<32x128xi1>
    %15 = arith.extui %14 : vector<32x128xi1> to vector<32x128xi32>
    %16 = arith.sitofp %15 : vector<32x128xi32> to vector<32x128xf32>
    %c0_2 = arith.constant 0 : index
    %c0_3 = arith.constant 0 : index
    %c0_4 = arith.constant 0 : index
    %17 = vector.load %arg5[%c0_2, %c0_3, %c0_4] : memref<1x128x128xf32, #tpu.memory_space<vmem>>, vector<1x128x128xf32>
    %18 = vector.shape_cast %17 : vector<1x128x128xf32> to vector<128x128xf32>
    %cst = arith.constant dense<0.000000e+00> : vector<32x128xf32>
    %19 = tpu.matmul %16, %18, %cst {dimension_numbers = #tpu.dot_dimension_numbers<[1], [0], [0], [1], [0, 0, 1, 1], [], []>} : vector<32x128xf32>, vector<128x128xf32>, vector<32x128xf32> -> vector<32x128xf32>
    %c0_5 = arith.constant 0 : index
    %c0_6 = arith.constant 0 : index
    %c0_7 = arith.constant 0 : index
    %20 = vector.load %arg4[%c0_5, %c0_6, %c0_7] : memref<1x2x128xi32, #tpu.memory_space<vmem>>, vector<1x2x128xi32>
    %21 = vector.shape_cast %20 : vector<1x2x128xi32> to vector<2x128xi32>
    %22 = vector.extract_strided_slice %21 {offsets = [0, 0], sizes = [1, 128], strides = [1, 1]} : vector<2x128xi32> to vector<1x128xi32>
    %23 = vector.extract_strided_slice %21 {offsets = [1, 0], sizes = [1, 128], strides = [1, 1]} : vector<2x128xi32> to vector<1x128xi32>
    %24 = vector.broadcast %3 : vector<32x1xi32> to vector<32x128xi32>
    %25 = vector.broadcast %22 : vector<1x128xi32> to vector<32x128xi32>
    %26 = arith.cmpi sge, %24, %25 : vector<32x128xi32>
    %27 = vector.broadcast %3 : vector<32x1xi32> to vector<32x128xi32>
    %28 = vector.broadcast %23 : vector<1x128xi32> to vector<32x128xi32>
    %29 = arith.cmpi slt, %27, %28 : vector<32x128xi32>
    %30 = arith.andi %26, %29 : vector<32x128xi1>
    %31 = arith.extui %30 : vector<32x128xi1> to vector<32x128xi32>
    %32 = arith.sitofp %31 : vector<32x128xi32> to vector<32x128xf32>
    %c0_8 = arith.constant 0 : index
    %c0_9 = arith.constant 0 : index
    %c0_10 = arith.constant 0 : index
    %33 = vector.load %arg6[%c0_8, %c0_9, %c0_10] : memref<1x128x128xf32, #tpu.memory_space<vmem>>, vector<1x128x128xf32>
    %34 = vector.shape_cast %33 : vector<1x128x128xf32> to vector<128x128xf32>
    %cst_11 = arith.constant dense<0.000000e+00> : vector<32x128xf32>
    %35 = tpu.matmul %32, %34, %cst_11 {dimension_numbers = #tpu.dot_dimension_numbers<[1], [0], [0], [1], [0, 0, 1, 1], [], []>} : vector<32x128xf32>, vector<128x128xf32>, vector<32x128xf32> -> vector<32x128xf32>
    %36 = arith.addf %19, %35 : vector<32x128xf32>
    %c0_12 = arith.constant 0 : index
    %c0_13 = arith.constant 0 : index
    %c0_14 = arith.constant 0 : index
    %37 = vector.load %arg7[%c0_12, %c0_13, %c0_14] : memref<1x32x128xf32, #tpu.memory_space<vmem>>, vector<1x32x128xf32>
    %38 = vector.shape_cast %37 : vector<1x32x128xf32> to vector<32x128xf32>
    %39 = vector.shape_cast %36 : vector<32x128xf32> to vector<1x32x128xf32>
    tpu.vector_store %arg7[%c0_12, %c0_13, %c0_14], %39 {strides = array<i32>} : memref<1x32x128xf32, #tpu.memory_space<vmem>>, vector<1x32x128xf32>,
    return
  }
  func.func @transform_0(%arg0: i32, %arg1: i32, %arg2: memref<2xi32, #tpu.memory_space<smem>>) -> (i32, i32, i32) {
    %c1_i32 = arith.constant 1 : i32
    %0 = arith.muli %arg0, %c1_i32 : i32
    %1 = arith.addi %0, %arg1 : i32
    %2 = arith.index_cast %1 : i32 to index
    %3 = memref.load %arg2[%2] : memref<2xi32, #tpu.memory_space<smem>>
    %c0_i32 = arith.constant 0 : i32
    %c0_i32_0 = arith.constant 0 : i32
    return %arg0, %c0_i32, %3 : i32, i32, i32
  }
  func.func @transform_1(%arg0: i32, %arg1: i32, %arg2: memref<2xi32, #tpu.memory_space<smem>>) -> (i32, i32, i32) {
    %c1_i32 = arith.constant 1 : i32
    %0 = arith.muli %arg0, %c1_i32 : i32
    %1 = arith.addi %0, %arg1 : i32
    %2 = arith.index_cast %1 : i32 to index
    %3 = memref.load %arg2[%2] : memref<2xi32, #tpu.memory_space<smem>>
    %c1_i32_0 = arith.constant 1 : i32
    %4 = arith.addi %3, %c1_i32_0 : i32
    %c0_i32 = arith.constant 0 : i32
    %c0_i32_1 = arith.constant 0 : i32
    return %arg0, %c0_i32, %4 : i32, i32, i32
  }
  func.func @transform_2(%arg0: i32, %arg1: i32, %arg2: memref<2xi32, #tpu.memory_space<smem>>) -> (i32, i32, i32) {
    %c1_i32 = arith.constant 1 : i32
    %0 = arith.muli %arg0, %c1_i32 : i32
    %1 = arith.addi %0, %arg1 : i32
    %2 = arith.index_cast %1 : i32 to index
    %3 = memref.load %arg2[%2] : memref<2xi32, #tpu.memory_space<smem>>
    %c0_i32 = arith.constant 0 : i32
    %c0_i32_0 = arith.constant 0 : i32
    return %arg0, %3, %c0_i32 : i32, i32, i32
  }
  func.func @transform_3(%arg0: i32, %arg1: i32, %arg2: memref<2xi32, #tpu.memory_space<smem>>) -> (i32, i32, i32) {
    %c1_i32 = arith.constant 1 : i32
    %0 = arith.muli %arg0, %c1_i32 : i32
    %1 = arith.addi %0, %arg1 : i32
    %2 = arith.index_cast %1 : i32 to index
    %3 = memref.load %arg2[%2] : memref<2xi32, #tpu.memory_space<smem>>
    %c1_i32_0 = arith.constant 1 : i32
    %4 = arith.addi %3, %c1_i32_0 : i32
    %c0_i32 = arith.constant 0 : i32
    %c0_i32_1 = arith.constant 0 : i32
    return %arg0, %4, %c0_i32 : i32, i32, i32
  }
  func.func @transform_4(%arg0: i32, %arg1: i32, %arg2: memref<2xi32, #tpu.memory_space<smem>>) -> (i32, i32, i32) {
    %c0_i32 = arith.constant 0 : i32
    %c0_i32_0 = arith.constant 0 : i32
    return %arg0, %arg1, %c0_i32 : i32, i32, i32
  }
}

</mosaic_0001>

<bundles_post_ra>
// kernel: custom-call.7
= control target key start
LH: loop header
LB: loop body
LE: loop exit
PB: predicated region body
PF: predicated region fallthrough
CT: control target
= control target key end

     0   :  { %s6_s0 = inlined_call_operand.vmem [shape: u32[2,1], index: 0, kind: output, shape index: {}]  }

// kernel: sub.5
= control target key start
LH: loop header
LB: loop body
LE: loop exit
PB: predicated region body
PF: predicated region fallthrough
CT: control target
= control target key end

     0   :  { %s34_s0 = inlined_call_operand.vmem [shape: s32[2,8], index: 0, kind: input, shape index: {}]   ;;  %s35_s1 = inlined_call_operand.vmem [shape: s32[2,8], index: 1, kind: input, shape index: {}]   ;;  %s36_s2 = inlined_call_operand.vmem [shape: s32[2,8], index: 2, kind: output, shape index: {}]  }
   0x1   :  { %v3_v0 = vld [vmem:[%s34_s0] sm:$0x3] }
   0x2   :  { %v4_v1 = vld [vmem:[%s35_s1] sm:$0x3] }
   0x3   :  { %v7_v2 = vsub.s32 %v3_v0, %v4_v1 }
   0x5   :  { %9 = vst [vmem:[%s36_s2] sm:$0x3] %v7_v2 }

// kernel: length_regulator.1
= control target key start
LH: loop header
LB: loop body
LE: loop exit
PB: predicated region body
PF: predicated region fallthrough
CT: control target
= control target key end

     0   :  { %s2329_s0 = inlined_call_operand.hbm [shape: s32[2], index: 0, kind: input, shape index: {}]   ;;  %s2330_s1 = inlined_call_operand.hbm [shape: s32[2,2,256], index: 1, kind: input, shape index: {}, may-alias: {1,2}]   ;;  %s2331_s2 = inlined_call_operand.hbm [shape: s32[2,2,256], index: 2, kind: input, shape index: {}, may-alias: {1,2}]   ;;  %s2332_s3 = inlined_call_operand.hbm [shape: f32[2,256,128], index: 3, kind: input, shape index: {}, may-alias: {3,4}]   ;;  %s2333_s4 = inlined_call_operand.hbm [shape: f32[2,256,128], index: 4, kind: input, shape index: {}, may-alias: {3,4}]   ;;  %s2334_s5 = inlined_call_operand.hbm [shape: f32[2,32,128], index: 5, kind: output, shape index: {}]  }
   0x1   :  { %2361 = sst [smem:[#allocation43_spill]] %s2330_s1  ;;  %s1283_s20 = scalar_lea.hbm %s2329_s0, 16 }
   0x2   :  { %2362 = sst [smem:[#allocation44_spill]] %s2331_s2  ;;  %p1284_p0 = scmp.ne.s32.totalorder %s2329_s0, %s1283_s20 }
   0x3   :  { %2363 = sst [smem:[#allocation45_spill]] %s2332_s3  ;;  %p1287_p1 = scmp.lt.u32.totalorder %s1283_s20, %s2329_s0 }
   0x4   :  { %2364 = sst [smem:[#allocation46_spill]] %s2333_s4 }
   0x5   :  { %2365 = sst [smem:[#allocation47_spill]] %s2334_s5  ;;  %p1289_p2 = pnand %p1287_p1, %p1284_p0 }
   0x7   :  { %1292 = shalt.err (!%p1289_p2)  }
   0x8   :  { %s1609_s25 = smov [#allocation3]  }
   0x9   :  { %11 = dma.hbm_to_smem %s2329_s0, 16, %s1609_s25, [#allocation2] }
   0xa   :  { %1515 = dma.done.wait [#allocation2], 16 }
   0xb   :  { %1516 = vsyncadd [#allocation2], 4294967280 }
   0xc   :  { %13 = sfence }
   0xd   :  { %14 = vsyncpa [#allocation5], 0 }
   0xe   :  { %16 = vsyncpa [#allocation5 + $0x1], 0 }
   0xf   :  { %17 = vsyncpa [#allocation8], 0 }
  0x10   :  { %19 = vsyncpa [#allocation8 + $0x1], 0 }
  0x11   :  { %20 = vsyncpa [#allocation11], 0 }
  0x12   :  { %22 = vsyncpa [#allocation11 + $0x1], 0 }
  0x13   :  { %23 = vsyncpa [#allocation6], 0 }
  0x14   :  { %25 = vsyncpa [#allocation6 + $0x1], 0  ;;  %s1662_s28 = smov 0   ;;  %s1664_s29 = smov 0  }
  0x15   :  { %s1666_s30 = smov 0   ;;  %s1668_s6 = smov 0  }
  0x16   :  { %s1670_s0 = smov 0   ;;  %s1672_s7 = smov 0  }
  0x17   :  { %s1674_s8 = smov 0   ;;  %s1676_s9 = smov 0  }
  0x18   :  { %s1678_s10 = smov 0   ;;  %s1680_s11 = smov 0  }
  0x19   :  { %s1682_s12 = smov 0   ;;  %s1684_s13 = smov 0  }
  0x1a   :  { %s1686_s14 = smov 0   ;;  %s1688_s15 = smov 0  }
  0x1b   :  { %s1690_s16 = smov 0   ;;  %s1692_s17 = smov 0  }
  0x1c   :  { %s1694_s18 = smov 0   ;;  %s1696_s19 = smov 0  }
  0x1d LB: > { %2366 = sst [smem:[#allocation27_spill]] %s1539_s28  ;;  %s1751_s20 = sadd.s32 4294967295, %s1607_s19   ;;  %s1607_s19 = sphi %s1696_s19, %s31_s19   ;;  %s1603_s18 = sphi %s1694_s18, %s2462_s18   ;;  %s1599_s17 = sphi %s1692_s17, %s2461_s17   ;;  %s1595_s16 = sphi %s1690_s16, %s2448_s16   ;;  %s1591_s15 = sphi %s1688_s15, %s2460_s15   ;;  %s1587_s14 = sphi %s1686_s14, %s2459_s14   ;;  %s1583_s13 = sphi %s1684_s13, %s2458_s13   ;;  %s1579_s12 = sphi %s1682_s12, %s2457_s12   ;;  %s1575_s11 = sphi %s1680_s11, %s2444_s11   ;;  %s1571_s10 = sphi %s1678_s10, %s2456_s10   ;;  %s1567_s9 = sphi %s1676_s9, %s2455_s9   ;;  %s1563_s8 = sphi %s1674_s8, %s2454_s8   ;;  %s1559_s7 = sphi %s1672_s7, %s2453_s7   ;;  %s1555_s0 = sphi %s1670_s0, %s2452_s0   ;;  %s1551_s6 = sphi %s1668_s6, %s2451_s6   ;;  %s1547_s30 = sphi %s1666_s30, %s2450_s30   ;;  %s1543_s29 = sphi %s1664_s29, %s2441_s29   ;;  %s1539_s28 = sphi %s1662_s28, %s2440_s28  }
  0x1e   : > { %2367 = sst [smem:[#allocation28_spill]] %s1543_s29  ;;  %s859_s21 = sadd.s32 4294967294, %s1607_s19  }
  0x1f   : > { %2368 = sst [smem:[#allocation29_spill]] %s1547_s30  ;;  %s43_s22 = sadd.s32 1, %s1603_s18 }
  0x20   : > { %2369 = sst [smem:[#allocation30_spill]] %s1551_s6  ;;  %p2351_p3 = scmp.eq.s32.totalorder %s1607_s19, 0 }
  0x21   : > { %2370 = sst [smem:[#allocation31_spill]] %s1579_s12  ;;  %p45_p4 = scmp.ge.s32.totalorder %s43_s22, 2 }
  0x22   : > { %2371 = sst [smem:[#allocation32_spill]] %s1583_s13  ;;  %p2350_p5 = scmp.eq.s32.totalorder %s1751_s20, 0 }
  0x23   : > { %2372 = sst [smem:[#allocation33_spill]] %s1595_s16  ;;  %s90_s24 = sadd.s32 1, %s1583_s13 }
  0x24   : > { %2373 = sst [smem:[#allocation34_spill]] %s1599_s17  ;;  %s2464_s22 = smov (%p45_p4, %s43_s22), 0 }
  0x25   : > { %s80_s23 = sld [smem:[#allocation3 + %s1603_s18]]  ;;  %p97_p6 = scmp.ne.s32.totalorder %s1583_s13, %s1579_s12 }
  0x26   : > { %2374 = sst [smem:[#allocation35_spill]] %s2464_s22  ;;  %p103_p7 = scmp.ne.s32.totalorder %s1579_s12, %s1575_s11 }
  0x27   : > { %s1766_s25 = ssub.s32 %s1603_s18, %s2464_s22  ;;  %s83_s26 = sld [smem:[#allocation3 + %s2464_s22]] }
  0x28   : > { %p1771_p8 = por %p97_p6, %p2351_p3  ;;  %p1777_p9 = por %p103_p7, %p2350_p5 }
  0x29   : > { %p182_p10 = scmp.eq.s32.totalorder %s1766_s25, 0  ;;  %s184_s11 = sadd.s32 1, %s1547_s30 }
  0x2a   : > { %s2376_s5 = scalar_select %p1777_p9, 1, 0 }
  0x2b   : > { %s81_s17 = sadd.s32 1, %s80_s23  ;;  %p194_p11 = scmp.ne.s32.totalorder %s1547_s30, %s1543_s29 }
  0x2c   : > { %2377 = sst [smem:[#allocation36_spill]] %s2376_s5  ;;  %p195_p12 = scmp.eq.s32.totalorder %s1751_s20, 1 }
  0x2d   : > { %s1786_s12 = scalar_select %p182_p10, %s1547_s30, %s184_s11  }
  0x2e   : > { %p200_p13 = scmp.ne.s32.totalorder %s1543_s29, %s1539_s28  ;;  %s84_s4 = sadd.s32 1, %s83_s26 }
  0x2f   : > { %2378 = sst [smem:[#allocation37_spill]] %s1786_s12  ;;  %p201_p0 = scmp.eq.s32.totalorder %s859_s21, 1 }
  0x30   : > { %s86_s5 = ssub.s32 %s81_s17, %s84_s4  ;;  %p1791_p1 = por %p195_p12, %p194_p11 }
  0x31   : > { %s87_s23 = sor.u32 %s86_s5, %s1766_s25  ;;  %p1796_p2 = por %p201_p0, %p200_p13 }
  0x32   : > { %s2379_s6 = scalar_select %p1791_p1, 1, 0 }
  0x33   : > { %s2381_s11 = scalar_select %p1796_p2, 1, 0 }
  0x34   : > { %2380 = sst [smem:[#allocation38_spill]] %s2379_s6  ;;  %p88_p4 = scmp.eq.s32.totalorder %s87_s23, 0 }
  0x35   : > { %2382 = sst [smem:[#allocation39_spill]] %s2381_s11  ;;  %p2349_p7 = scmp.lt.s32.totalorder %s1607_s19, 2 }
  0x36   : > { %s1804_s12 = scalar_select %p88_p4, %s1583_s13, %s90_s24  }
  0x37   : > { %s243_s4 = sand.u32 1, %s1607_s19   ;;  %s245_s17 = sand.u32 1, %s1583_s13  }
  0x38   : > { %2383 = sst [smem:[#allocation40_spill]] %s1804_s12  ;;  %s865_s21 = sshll.u32 %s245_s17, 1 }
  0x39   : > { %p1812_p10 = pnand %p2349_p7, %p1771_p8  ;;  %s247_s24 = scalar_lea.vmem [#allocation7], %s865_s21 }
  0x3a   : > { %s1091_s23 = scalar_select %p1771_p8, [#allocation3], [#allocation14] }
  0x3b   : > { %s1092_s30 = scalar_select %p1771_p8, %s1603_s18, 0 }
  0x3c   : > { %s2466_s23 = smov (!%p2349_p7, %s1091_s23), [#allocation18]  ;;  %s259_s26 = sshll.u32 %s247_s24, 4  ;;  %s1825_s26 = int_to_ptr.vmem [resolvable:$true] %s259_s26 }
  0x3d   : > { %s2468_s30 = smov (!%p2349_p7, %s1092_s30), 0  ;;  %p876_p11 = scmp.ge.s32.totalorder %s1607_s19, 1 }
  0x3e   : > { %s249_s17 = sld [smem:[%s2466_s23 + %s2468_s30]]  ;;  %p315_p12 = scmp.lt.s32.totalorder %s1607_s19, 3 }
  0x3f   : > { %s2387_s27 = sshll.u32 %s1603_s18, 1  ;;  %s1836_s28 = sld [smem:[#allocation3 + %s1603_s18]] }
  0x40   : > { %p1829_p13 = pnand %p876_p11, %p315_p12  ;;  %s2388_s2 = sld [smem:[#allocation44_spill]] }
  0x41   : > { %s1842_s24 = sld [smem:[#allocation3 + %s2464_s22]]  ;;  %s56_s23 = sadd.s32 1, %s1595_s16 }
  0x42   : > { %s2385_s12 = scalar_select %p1829_p13, 1, 0 }
  0x43   : > { %s1847_s3 = scalar_lea.sflag [#allocation8], %s243_s4  ;;  %p1295_p0 = pneg %p1812_p10 }
  0x44   : > { %2386 = sst [smem:[#allocation41_spill]] %s2385_s12  ;;  %s740_s13 = sadd.s32 %s2387_s27, %s249_s17 }
  0x45   : > { %s867_s11 = sshll.u32 %s740_s13, 5 }
  0x46   : > { %s742_s21 = scalar_lea.hbm %s2388_s2, %s867_s11  ;;  %s1298_s13 = scalar_lea.hbm %s2388_s2, 128 }
  0x47   : > { %s1844_s30 = scalar_lea.hbm %s742_s21, 32  ;;  %s1323_s12 = scalar_lea.hbm %s742_s21, 64 }
  0x48   : > { %p1294_p8 = scmp.ne.s32.totalorder %s1844_s30, %s1323_s12  ;;  %p1299_p12 = scmp.lt.u32.totalorder %s1844_s30, %s2388_s2 }
  0x49   : > { %p1300_p6 = scmp.lt.u32.totalorder %s1298_s13, %s1323_s12  ;;  %p1302_p5 = scmp.lt.u32.totalorder %s1323_s12, %s1844_s30 }
  0x4a   : > { %p1296_p4 = pnand %p1295_p0, %p1294_p8 }
  0x4b   : > { %p1301_p7 = por %p1300_p6, %p1299_p12 }
  0x4c   : > { %p1297_p11 = pneg %p1296_p4 }
  0x4d   : > { %p1303_p3 = por %p1302_p5, %p1301_p7 }
  0x4f   : > { %p1304_p2 = pnand %p1303_p3, %p1297_p11 }
  0x51   : > { %1307 = shalt.err (!%p1304_p2)
}
  0x52   : > { %s1308_s4 = scalar_lea.vmem %s1825_s26, 32  ;;  %s1610_s27 = smov [#allocation7]  }
  0x53   : > { %p1309_p8 = scmp.ne.s32.totalorder %s1825_s26, %s1308_s4  ;;  %s1313_s21 = sshll.u32 %s1610_s27, 4  ;;  %s1314_s21 = int_to_ptr.vmem [resolvable:$false] %s1313_s21 }
  0x54   : > { %s1315_s29 = scalar_lea.vmem %s1314_s21, 64  ;;  %p1316_p9 = scmp.lt.s32.totalorder %s1825_s26, %s1314_s21 }
  0x55   : > { %p1311_p4 = pnand %p1309_p8, %p1295_p0  ;;  %p1317_p6 = scmp.lt.s32.totalorder %s1315_s29, %s1308_s4 }
  0x57   : > { %p1312_p1 = pneg %p1311_p4  ;;  %p1318_p12 = por %p1317_p6, %p1316_p9 }
  0x59   : > { %p1319_p5 = pnand %p1318_p12, %p1312_p1 }
  0x5b   : > { %1322 = shalt.err (!%p1319_p5)
}
  0x5c   : > { %1116 = dma.hbm_to_vmem [thread:$0]  (!%p1812_p10), %s1844_s30, 32, %s1825_s26, %s1847_s3  }
  0x5d   : > { %p63_p3 = scmp.ne.s32.totalorder %s1595_s16, %s1591_s15  ;;  %p69_p9 = scmp.ne.s32.totalorder %s1591_s15, %s1587_s14 }
  0x5e   : > { %s221_s12 = sand.u32 1, %s1595_s16   ;;  %p2389_p1 = scmp.eq.s32.totalorder %s1607_s19, 0 }
  0x5f   : > { %p2391_p7 = scmp.eq.s32.totalorder %s1751_s20, 0  ;;  %s52_s26 = ssub.s32 %s1836_s28, %s1842_s24 }
  0x60   : > { %p1881_p2 = por %p2389_p1, %p63_p3  ;;  %s53_s30 = sor.u32 %s52_s26, %s1766_s25 }
  0x61   : > { %p1887_p0 = por %p2391_p7, %p69_p9  ;;  %s862_s14 = sshll.u32 %s221_s12, 1 }
  0x62   : > { %p54_p10 = scmp.eq.s32.totalorder %s53_s30, 0  ;;  %p2394_p11 = scmp.lt.s32.totalorder %s1607_s19, 2 }
  0x63   : > { %s2392_s6 = scalar_select %p1887_p0, 1, 0 }
  0x64   : > { %s1088_s13 = scalar_select %p1881_p2, [#allocation3], [#allocation13] }
  0x65   : > { %s1899_s11 = scalar_select %p54_p10, %s1595_s16, %s56_s23  }
  0x66   : > { %s1089_s17 = scalar_select %p1881_p2, %s1603_s18, 0 }
  0x67   : > { %2393 = sst [smem:[#allocation42_spill]] %s1899_s11  ;;  %s2470_s13 = smov (!%p2394_p11, %s1088_s13), [#allocation17] }
  0x68   : > { %p2395_p8 = pmov %p2394_p11  ;;  %s225_s28 = scalar_lea.vmem [#allocation4], %s862_s14 }
  0x69   : > { %s236_s24 = sshll.u32 %s225_s28, 4  ;;  %s1919_s23 = sld [smem:[#allocation3 + %s1603_s18]]  ;;  %s1916_s24 = int_to_ptr.vmem [resolvable:$true] %s236_s24 }
  0x6a   : > { %s2472_s17 = smov (!%p2395_p8, %s1089_s17), 0  ;;  %p2396_p4 = pmov %p2395_p8 }
  0x6b   : > { %s227_s27 = sld [smem:[%s2470_s13 + %s2472_s17]]  ;;  %p129_p12 = scmp.ne.s32.totalorder %s1571_s10, %s1567_s9 }
  0x6c   : > { %p1912_p6 = pnand %p2396_p4, %p1881_p2  ;;  %s1922_s21 = sld [smem:[#allocation3 + %s2464_s22]] }
  0x6d   : > { %s2398_s26 = sshll.u32 %s1603_s18, 1  ;;  %p135_p5 = scmp.ne.s32.totalorder %s1567_s9, %s1563_s8 }
  0x6e   : > { %p2399_p3 = pmov %p2389_p1  ;;  %s2401_s1 = sld [smem:[#allocation43_spill]] }
  0x6f   : > { %p2402_p1 = pmov %p2391_p7  ;;  %s222_s8 = scalar_lea.sflag [#allocation5], %s221_s12 }
  0x70   : > { %p1933_p9 = por %p129_p12, %p2399_p3  ;;  %p1326_p10 = pneg %p1912_p6 }
  0x71   : > { %s232_s30 = sadd.s32 %s2398_s26, %s227_s27  ;;  %p1944_p2 = por %p135_p5, %p2402_p1 }
  0x72   : > { %s864_s5 = sshll.u32 %s232_s30, 5 }
  0x73   : > { %s2403_s29 = scalar_select %p1944_p2, 1, 0 }
  0x74   : > { %s1940_s17 = scalar_lea.hbm %s2401_s1, %s864_s5  ;;  %s1329_s5 = scalar_lea.hbm %s2401_s1, 128 }
  0x75   : > { %s1324_s27 = scalar_lea.hbm %s1940_s17, 32  ;;  %p1330_p4 = scmp.lt.u32.totalorder %s1940_s17, %s2401_s1 }
  0x76   : > { %p1325_p7 = scmp.ne.s32.totalorder %s1940_s17, %s1324_s27  ;;  %p1331_p12 = scmp.lt.u32.totalorder %s1329_s5, %s1324_s27 }
  0x77   : > { %p1333_p3 = scmp.lt.u32.totalorder %s1324_s27, %s1940_s17 }
  0x78   : > { %p1327_p11 = pnand %p1326_p10, %p1325_p7  ;;  %p1332_p5 = por %p1331_p12, %p1330_p4 }
  0x7a   : > { %p1328_p8 = pneg %p1327_p11  ;;  %p1334_p1 = por %p1333_p3, %p1332_p5 }
  0x7c   : > { %p1335_p2 = pnand %p1334_p1, %p1328_p8 }
  0x7e   : > { %1338 = shalt.err (!%p1335_p2)
}
  0x7f   : > { %s1339_s12 = scalar_lea.vmem %s1916_s24, 32  ;;  %s1611_s26 = smov [#allocation4]  }
  0x80   : > { %p1340_p7 = scmp.ne.s32.totalorder %s1916_s24, %s1339_s12  ;;  %s1344_s30 = sshll.u32 %s1611_s26, 4  ;;  %s1345_s30 = int_to_ptr.vmem [resolvable:$false] %s1344_s30 }
  0x81   : > { %s1346_s28 = scalar_lea.vmem %s1345_s30, 64  ;;  %p1347_p13 = scmp.lt.s32.totalorder %s1916_s24, %s1345_s30 }
  0x82   : > { %p1342_p11 = pnand %p1340_p7, %p1326_p10  ;;  %p1348_p4 = scmp.lt.s32.totalorder %s1346_s28, %s1339_s12 }
  0x84   : > { %p1343_p0 = pneg %p1342_p11  ;;  %p1349_p12 = por %p1348_p4, %p1347_p13 }
  0x86   : > { %p1350_p5 = pnand %p1349_p12, %p1343_p0 }
  0x88   : > { %1353 = shalt.err (!%p1350_p5)
}
  0x89   : > { %1111 = dma.hbm_to_vmem [thread:$0]  (!%p1912_p6), %s1940_s17, 32, %s1916_s24, %s222_s8  }
  0x8a   : > { %s118_s27 = ssub.s32 %s1919_s23, %s1922_s21  ;;  %s268_s5 = sand.u32 1, %s1571_s10  }
  0x8b   : > { %s119_s4 = sor.u32 %s118_s27, %s1766_s25  ;;  %s868_s13 = sshll.u32 %s268_s5, 7 }
  0x8c   : > { %p120_p13 = scmp.eq.s32.totalorder %s119_s4, 0  ;;  %s2404_s26 = sadd.s32 1, %s1571_s10 }
  0x8d   : > { %s1094_s12 = scalar_select %p1933_p9, [#allocation3], [#allocation15] }
  0x8e   : > { %s1982_s30 = scalar_select %p120_p13, %s1571_s10, %s2404_s26  }
  0x8f   : > { %s1095_s28 = scalar_select %p1933_p9, %s1603_s18, 0 }
  0x90   : > { %p2405_p0 = scmp.lt.s32.totalorder %s1607_s19, 2  ;;  %s270_s24 = scalar_lea.vmem [#allocation9], %s868_s13 }
  0x91   : > { %s281_s23 = sshll.u32 %s270_s24, 4  ;;  %s870_s17 = sshll.u32 %s1603_s18, 5  ;;  %s1992_s23 = int_to_ptr.vmem [resolvable:$true] %s281_s23 }
  0x92   : > { %s2474_s12 = smov (!%p2405_p0, %s1094_s12), [#allocation19]  ;;  %p2406_p6 = pmov %p2405_p0 }
  0x93   : > { %p2407_p2 = pmov %p2405_p0  ;;  %s2003_s5 = sld [smem:[#allocation3 + %s1603_s18]] }
  0x94   : > { %s2476_s28 = smov (!%p2406_p6, %s1095_s28), 0  ;;  %s2008_s26 = sld [smem:[#allocation3 + %s2464_s22]] }
  0x95   : > { %s272_s21 = sld [smem:[%s2474_s12 + %s2476_s28]]  ;;  %p1998_p10 = pnand %p2407_p2, %p1933_p9 }
  0x96   : > { %s2409_s24 = sld [smem:[#allocation45_spill]]  ;;  %p163_p9 = scmp.ne.s32.totalorder %s1559_s7, %s1555_s0 }
  0x97   : > { %p1356_p3 = pneg %p1998_p10 }
  0x9b   : > { %s869_s27 = sshll.u32 %s272_s21, 4 }
  0x9c   : > { %s278_s4 = sadd.s32 %s870_s17, %s869_s27 }
  0x9d   : > { %s871_s13 = sshll.u32 %s278_s4, 7  ;;  %s1359_s4 = scalar_lea.hbm %s2409_s24, 8192 }
  0x9e   : > { %s2013_s1 = scalar_lea.hbm %s2409_s24, %s871_s13 }
  0x9f   : > { %s1354_s14 = scalar_lea.hbm %s2013_s1, 2048  ;;  %p1360_p11 = scmp.lt.u32.totalorder %s2013_s1, %s2409_s24 }
  0xa0   : > { %p1355_p8 = scmp.ne.s32.totalorder %s2013_s1, %s1354_s14  ;;  %p1361_p4 = scmp.lt.u32.totalorder %s1359_s4, %s1354_s14 }
  0xa1   : > { %p1363_p5 = scmp.lt.u32.totalorder %s1354_s14, %s2013_s1 }
  0xa2   : > { %p1357_p1 = pnand %p1356_p3, %p1355_p8  ;;  %p1362_p12 = por %p1361_p4, %p1360_p11 }
  0xa4   : > { %p1358_p7 = pneg %p1357_p1  ;;  %p1364_p13 = por %p1363_p5, %p1362_p12 }
  0xa6   : > { %p1365_p0 = pnand %p1364_p13, %p1358_p7 }
  0xa8   : > { %1368 = shalt.err (!%p1365_p0)
}
  0xa9   : > { %s1369_s28 = scalar_lea.vmem %s1992_s23, 2048  ;;  %s1612_s21 = smov [#allocation9]  }
  0xaa   : > { %p1370_p6 = scmp.ne.s32.totalorder %s1992_s23, %s1369_s28  ;;  %s1374_s27 = sshll.u32 %s1612_s21, 4  ;;  %s1375_s27 = int_to_ptr.vmem [resolvable:$false] %s1374_s27 }
  0xab   : > { %s1376_s12 = scalar_lea.vmem %s1375_s27, 4096  ;;  %p1377_p1 = scmp.lt.s32.totalorder %s1992_s23, %s1375_s27 }
  0xac   : > { %p1372_p2 = pnand %p1370_p6, %p1356_p3  ;;  %p1378_p11 = scmp.lt.s32.totalorder %s1376_s12, %s1369_s28 }
  0xae   : > { %p1373_p8 = pneg %p1372_p2  ;;  %p1379_p4 = por %p1378_p11, %p1377_p1 }
  0xb0   : > { %p1380_p12 = pnand %p1379_p4, %p1373_p8 }
  0xb2   : > { %1383 = shalt.err (!%p1380_p12)
}
  0xb3   : > { %s2356_s14 = smov 128   ;;  %s2410_s4 = sld [smem:[#allocation30_spill]] }
  0xb4   : > { %s2357_s13 = smov 8   ;;  %s147_s28 = sadd.s32 1, %s2003_s5 }
  0xb5   : > { %1121 = dma.hbm_to_vmem [thread:$0]  (!%p1998_p10), %s2013_s1, 2048, %s1992_s23, %s1847_s3, %s2356_s14, %s2356_s14, %s2357_s13  }
  0xb6   : > { %p2411_p7 = scmp.eq.s32.totalorder %s1607_s19, 0  ;;  %s150_s27 = sadd.s32 1, %s2008_s26 }
  0xb7   : > { %p2413_p13 = scmp.eq.s32.totalorder %s1751_s20, 0  ;;  %s152_s12 = ssub.s32 %s147_s28, %s150_s27 }
  0xb8   : > { %p2054_p5 = por %p163_p9, %p2411_p7  ;;  %s153_s1 = sor.u32 %s152_s12, %s1766_s25 }
  0xb9   : > { %p169_p3 = scmp.ne.s32.totalorder %s1555_s0, %s2410_s4  ;;  %s156_s3 = sadd.s32 1, %s1559_s7 }
  0xba   : > { %p154_p10 = scmp.eq.s32.totalorder %s153_s1, 0  ;;  %s291_s23 = sand.u32 1, %s1559_s7  }
  0xbb   : > { %p2061_p0 = por %p169_p3, %p2413_p13  ;;  %p2415_p9 = scmp.lt.s32.totalorder %s1607_s19, 2 }
  0xbc   : > { %s1097_s5 = scalar_select %p2054_p5, [#allocation3], [#allocation16] }
  0xbd   : > { %s2071_s4 = scalar_select %p154_p10, %s1559_s7, %s156_s3  }
  0xbe   : > { %s1098_s14 = scalar_select %p2054_p5, %s1603_s18, 0 }
  0xbf   : > { %s2478_s5 = smov (!%p2415_p9, %s1097_s5), [#allocation20]  ;;  %p2416_p6 = pmov %p2415_p9 }
  0xc0   : > { %s872_s26 = sshll.u32 %s291_s23, 7  ;;  %s2419_s22 = sld [smem:[#allocation46_spill]] }
  0xc1   : > { %s2480_s14 = smov (!%p2416_p6, %s1098_s14), 0  ;;  %p2417_p2 = pmov %p2416_p6 }
  0xc2   : > { %s297_s25 = sld [smem:[%s2478_s5 + %s2480_s14]]  ;;  %s295_s27 = scalar_lea.vmem [#allocation10], %s872_s26 }
  0xc3   : > { %p2084_p8 = pnand %p2417_p2, %p2054_p5  ;;  %s307_s12 = sshll.u32 %s295_s27, 4  ;;  %s2090_s12 = int_to_ptr.vmem [resolvable:$true] %s307_s12 }
  0xc4   : > { %s2097_s16 = scalar_lea.sflag [#allocation11], %s291_s23 }
  0xc5   : > { %p1386_p11 = pneg %p2084_p8 }
  0xc6   : > { %s1389_s2 = scalar_lea.hbm %s2419_s22, 8192 }
  0xc8   : > { %s873_s1 = sshll.u32 %s297_s25, 4 }
  0xc9   : > { %s757_s3 = sadd.s32 %s873_s1, %s870_s17 }
  0xca   : > { %s875_s13 = sshll.u32 %s757_s3, 7 }
  0xcb   : > { %s759_s21 = scalar_lea.hbm %s2419_s22, %s875_s13 }
  0xcc   : > { %s2095_s11 = scalar_lea.hbm %s759_s21, 2048  ;;  %s1414_s14 = scalar_lea.hbm %s759_s21, 4096 }
  0xcd   : > { %p1385_p1 = scmp.ne.s32.totalorder %s2095_s11, %s1414_s14  ;;  %p1390_p3 = scmp.lt.u32.totalorder %s2095_s11, %s2419_s22 }
  0xce   : > { %p1391_p7 = scmp.lt.u32.totalorder %s1389_s2, %s1414_s14  ;;  %p1393_p13 = scmp.lt.u32.totalorder %s1414_s14, %s2095_s11 }
  0xcf   : > { %p1387_p4 = pnand %p1386_p11, %p1385_p1 }
  0xd0   : > { %p1392_p5 = por %p1391_p7, %p1390_p3 }
  0xd1   : > { %p1388_p12 = pneg %p1387_p4 }
  0xd2   : > { %p1394_p10 = por %p1393_p13, %p1392_p5 }
  0xd4   : > { %p1395_p9 = pnand %p1394_p10, %p1388_p12 }
  0xd6   : > { %1398 = shalt.err (!%p1395_p9)
}
  0xd7   : > { %s1399_s23 = scalar_lea.vmem %s2090_s12, 2048  ;;  %s1615_s26 = smov [#allocation10]  }
  0xd8   : > { %p1400_p6 = scmp.ne.s32.totalorder %s2090_s12, %s1399_s23  ;;  %s1404_s25 = sshll.u32 %s1615_s26, 4  ;;  %s1405_s25 = int_to_ptr.vmem [resolvable:$false] %s1404_s25 }
  0xd9   : > { %s1406_s27 = scalar_lea.vmem %s1405_s25, 4096  ;;  %p1407_p4 = scmp.lt.s32.totalorder %s2090_s12, %s1405_s25 }
  0xda   : > { %p1402_p2 = pnand %p1400_p6, %p1386_p11  ;;  %p1408_p3 = scmp.lt.s32.totalorder %s1406_s27, %s1399_s23 }
  0xdc   : > { %p1403_p1 = pneg %p1402_p2  ;;  %p1409_p7 = por %p1408_p3, %p1407_p4 }
  0xde   : > { %p1410_p5 = pnand %p1409_p7, %p1403_p1 }
  0xe0   : > { %1413 = shalt.err (!%p1410_p5)
}
  0xe1   : > { %s2420_s1 = smov 8   ;;  %s2421_s3 = smov 128  }
  0xe2   : > { %1126 = dma.hbm_to_vmem [thread:$0]  (!%p2084_p8), %s2095_s11, 2048, %s2090_s12, %s2097_s16, %s2421_s3, %s2421_s3, %s2420_s1  }
  0xe3   : > { %s2422_s21 = sld [smem:[#allocation41_spill]] }
  0xe9   : > { %p2423_p11 = scmp.ne.s32.totalorder %s2422_s21, 0 }
  0xea   : > { %s321_s14 = sand.u32 (!%p2423_p11), 1, %s1591_s15   ;;  %p2424_p12 = scmp.ne.s32.totalorder (!%p2423_p11), %s2392_s6, 0 }
  0xeb   : > { %319 = sbr.rel (%p2423_p11) target bundleno = 531 (0x213), region = 36  ;;  %s2130_s17 = sshll.u32 (!%p2423_p11), %s321_s14, 1 }
  0xec   : > { %s322_s5 = scalar_lea.sflag (!%p2423_p11), [#allocation5], %s321_s14  ;;  %s325_s2 = scalar_lea.vmem (!%p2423_p11), [#allocation4], %s2130_s17 }
  0xf2   : > { %1518 = dma.done.wait (%p2424_p12), %s322_s5, 32  }
  0xf3   : > { %1520 = vsyncadd (%p2424_p12), %s322_s5, 4294967264  ;;  %s2425_s28 = sld [smem:[#allocation31_spill]]  ;;  %s2426_s24 = sld [smem:[#allocation36_spill]] }
  0xf4   : > { %s330_s16 = sand.u32 1, %s1751_s20  }
  0xf5   : > { %s331_s13 = scalar_lea.sflag [#allocation8], %s330_s16 }
  0xf9   : > { %s332_s11 = sand.u32 1, %s2425_s28   ;;  %p2427_p8 = scmp.ne.s32.totalorder %s2426_s24, 0 }
  0xfa   : > { %s2139_s12 = sshll.u32 %s332_s11, 1 }
  0xfb   : > { %s334_s23 = scalar_lea.vmem [#allocation7], %s2139_s12 }
  0xfc   : > { %1522 = dma.done.wait (%p2427_p8), %s331_s13, 32  }
  0xfd   : > { %1524 = vsyncadd (%p2427_p8), %s331_s13, 4294967264  ;;  %s341_s26 = sand.u32 1, %s1567_s9   ;;  %p2428_p13 = scmp.ne.s32.totalorder %s2403_s29, 0 }
  0xfe   : > { %s879_s6 = sshll.u32 %s341_s26, 7 }
  0xff   : > { %s2147_s25 = scalar_lea.vmem [#allocation9], %s879_s6 }
 0x100   : > { %1526 = dma.done.wait (%p2428_p13), %s331_s13, 2048  }
 0x101   : > { %1528 = vsyncadd (%p2428_p13), %s331_s13, 4294965248  ;;  %s348_s20 = sand.u32 1, %s1555_s0  }
 0x102   : > { %s880_s27 = sshll.u32 %s348_s20, 7  ;;  %s349_s1 = scalar_lea.sflag [#allocation11], %s348_s20 }
 0x103   : > { %s2154_s3 = scalar_lea.vmem [#allocation10], %s880_s27 }
 0x104   : > { %1530 = dma.done.wait (%p2061_p0), %s349_s1, 2048  }
 0x105   : > { %1532 = vsyncadd (%p2061_p0), %s349_s1, 4294965248  ;;  %v406_v0 = vlaneseq  ;;  %v490_v1 = vld [vmem:[%s2154_s3] sm:$0xff]  ;;  %v491_v2 = vld [vmem:[%s2154_s3 + $0x8] sm:$0xff]  ;;  %v1616_v44 = vmov 1.0   ;;  %s2429_s29 = sld [smem:[#allocation28_spill]]  ;;  %s2430_s8 = sld [smem:[#allocation34_spill]] }
 0x106   : > { %v445_v3 = vld [vmem:[%s2147_s25] sm:$0xff]  ;;  %v1020_v4 = vpack.c.bf16 %v491_v2, %v490_v1  ;;  %v446_v5 = vld [vmem:[%s2147_s25 + $0x8] sm:$0xff]  ;;  %v492_v6 = vld [vmem:[%s2154_s3 + $0x10] sm:$0xff]  ;;  %s2431_s28 = sld [smem:[#allocation38_spill]]  ;;  %s2432_s11 = sld [smem:[#allocation47_spill]] }
 0x107   : > { %v493_v7 = vld [vmem:[%s2154_s3 + $0x18] sm:$0xff]  ;;  %v1052_v8 = vpack.c.bf16 %v446_v5, %v445_v3  ;;  %v447_v10 = vld [vmem:[%s2147_s25 + $0x10] sm:$0xff]  ;;  %v494_v12 = vld [vmem:[%s2154_s3 + $0x20] sm:$0xff]  ;;  %v2172_v17 = vshrl.u32 %v406_v0, 7  ;;  %s1617_s6 = smov [#allocation12]  }
 0x108   : > { %v1024_v9 = vpack.c.bf16 %v493_v7, %v492_v6  ;;  %v448_v11 = vld [vmem:[%s2147_s25 + $0x18] sm:$0xff]  ;;  %1021 = vmatprep.subr.bf16.mxu1 %v1020_v4  ;;  %v495_v14 = vld [vmem:[%s2154_s3 + $0x28] sm:$0xff]  ;;  %v449_v15 = vld [vmem:[%s2147_s25 + $0x20] sm:$0xff] }
 0x109   : > { %v1056_v13 = vpack.c.bf16 %v448_v11, %v447_v10  ;;  %v450_v16 = vld [vmem:[%s2147_s25 + $0x28] sm:$0xff]  ;;  %1053 = vmatprep.subr.bf16.mxu0 %v1052_v8  ;;  %1023 = vmatpush3.bf16.msra.mxu1 %v1020_v4  ;;  %v1028_v18 = vpack.c.bf16 %v495_v14, %v494_v12  ;;  %v496_v20 = vld [vmem:[%s2154_s3 + $0x30] sm:$0xff]  ;;  %v497_v21 = vld [vmem:[%s2154_s3 + $0x38] sm:$0xff]  ;;  %v419_v24 = vsub.s32 0, %v2172_v17  ;;  %v427_v25 = vsub.s32 1, %v2172_v17 }
 0x10a   : > { %1055 = vmatpush3.bf16.msra.mxu0 %v1052_v8  ;;  %1025 = vmatprep.subr.bf16.mxu1 %v1024_v9  ;;  %v1060_v19 = vpack.c.bf16 %v450_v16, %v449_v15  ;;  %v451_v22 = vld [vmem:[%s2147_s25 + $0x30] sm:$0xff]  ;;  %v452_v23 = vld [vmem:[%s2147_s25 + $0x38] sm:$0xff]  ;;  %v1032_v26 = vpack.c.bf16 %v497_v21, %v496_v20  ;;  %v498_v28 = vld [vmem:[%s2154_s3 + $0x40] sm:$0xff]  ;;  %v408_v57 = vadd.s32 8, %v2172_v17  ;;  %v409_v60 = vadd.s32 16, %v2172_v17 }
 0x10b   : > { %1057 = vmatprep.subr.bf16.mxu0 %v1056_v13  ;;  %v1064_v27 = vpack.c.bf16 %v452_v23, %v451_v22  ;;  %v499_v29 = vld [vmem:[%s2154_s3 + $0x48] sm:$0xff]  ;;  %v461_v30 = vld [vmem:[%s334_s23] sm:$0x3]  ;;  %v453_v31 = vld [vmem:[%s2147_s25 + $0x40] sm:$0xff]  ;;  %v410_v61 = vadd.s32 24, %v2172_v17  ;;  %s389_s21 = sand.u32 1, %s2429_s29  }
 0x10c   : > { %v454_v32 = vld [vmem:[%s2147_s25 + $0x48] sm:$0xff]  ;;  %v2186_v33 = vrot.slane %v461_v30, %v419_v24  ;;  %v2188_v34 = vrot.slane %v461_v30, %v427_v25  ;;  %v416_v35 = vld [vmem:[%s325_s2] sm:$0x3]  ;;  %v1036_v38 = vpack.c.bf16 %v499_v29, %v498_v28  ;;  %v500_v40 = vld [vmem:[%s2154_s3 + $0x50] sm:$0xff]  ;;  %s881_s14 = sshll.u32 %s389_s21, 5  ;;  %s903_s2 = sshll.u32 %s2430_s8, 9 }
 0x10d   : > { %1027 = vmatpush3.bf16.msra.mxu1 %v1024_v9  ;;  %v2192_v36 = vrot.slane %v416_v35, %v419_v24  ;;  %v2194_v37 = vrot.slane %v416_v35, %v427_v25  ;;  %v1068_v39 = vpack.c.bf16 %v454_v32, %v453_v31  ;;  %v501_v41 = vld [vmem:[%s2154_s3 + $0x58] sm:$0xff]  ;;  %v455_v42 = vld [vmem:[%s2147_s25 + $0x50] sm:$0xff]  ;;  %v502_v47 = vld [vmem:[%s2154_s3 + $0x60] sm:$0xff]  ;;  %s391_s17 = scalar_lea.vmem [#allocation12], %s881_s14  ;;  %s2433_s23 = smov %s2432_s11 }
 0x10e   : > { %1059 = vmatpush3.bf16.msra.mxu0 %v1056_v13  ;;  %1029 = vmatprep.subr.bf16.mxu1 %v1028_v18  ;;  %vm466_vm0 = vcmp.ge.s32.totalorder %v2172_v17, %v2186_v33  ;;  %vm474_vm1 = vcmp.lt.s32.totalorder %v2172_v17, %v2188_v34  ;;  %v456_v43 = vld [vmem:[%s2147_s25 + $0x58] sm:$0xff]  ;;  %v1040_v45 = vpack.c.bf16 %v501_v41, %v500_v40  ;;  %v503_v48 = vld [vmem:[%s2154_s3 + $0x68] sm:$0xff]  ;;  %v457_v49 = vld [vmem:[%s2147_s25 + $0x60] sm:$0xff]  ;;  %s696_s5 = sshll.u32 %s391_s17, 4  ;;  %s2238_s12 = scalar_lea.hbm %s2432_s11, %s903_s2  ;;  %s2233_s5 = int_to_ptr.vmem [resolvable:$true] %s696_s5 }
 0x10f   : > { %1061 = vmatprep.subr.bf16.mxu0 %v1060_v19  ;;  %vm478_vm2 = vmand %vm466_vm0, %vm474_vm1  ;;  %vm421_vm3 = vcmp.ge.s32.totalorder %v2172_v17, %v2192_v36  ;;  %vm429_vm4 = vcmp.lt.s32.totalorder %v2172_v17, %v2194_v37  ;;  %v1072_v46 = vpack.c.bf16 %v456_v43, %v455_v42  ;;  %v458_v50 = vld [vmem:[%s2147_s25 + $0x68] sm:$0xff]  ;;  %v1044_v51 = vpack.c.bf16 %v503_v48, %v502_v47  ;;  %v504_v53 = vld [vmem:[%s2154_s3 + $0x70] sm:$0xff]  ;;  %s2240_s13 = scalar_lea.sflag [#allocation6], %s389_s21  ;;  %s1415_s26 = scalar_lea.vmem %s2233_s5, 512 }
 0x110   : > { %976 = vmatprep.mubr.msk.f32.mxu1 %vm478_vm2, %v1616_v44  ;;  %vm433_vm5 = vmand %vm421_vm3, %vm429_vm4  ;;  %v1076_v52 = vpack.c.bf16 %v458_v50, %v457_v49  ;;  %v505_v54 = vld [vmem:[%s2154_s3 + $0x78] sm:$0xff]  ;;  %v459_v55 = vld [vmem:[%s2147_s25 + $0x70] sm:$0xff]  ;;  %vm467_vm6 = vcmp.ge.s32.totalorder %v408_v57, %v2186_v33  ;;  %vm475_vm7 = vcmp.lt.s32.totalorder %v408_v57, %v2188_v34  ;;  %vm422_vm8 = vcmp.ge.s32.totalorder %v408_v57, %v2192_v36  ;;  %p1416_p0 = scmp.ne.s32.totalorder %s2233_s5, %s1415_s26  ;;  %p2434_p10 = scmp.ne.s32.totalorder %s2431_s28, 0 }
 0x111   : > { %1031 = vmatpush3.bf16.msra.mxu1 %v1028_v18  ;;  %1014 = vmatprep.mubr.msk.f32.mxu0 %vm433_vm5, %v1616_v44  ;;  %v460_v56 = vld [vmem:[%s2147_s25 + $0x78] sm:$0xff]  ;;  %v1048_v58 = vpack.c.bf16 %v505_v54, %v504_v53  ;;  %vm430_vm9 = vcmp.lt.s32.totalorder %v408_v57, %v2194_v37  ;;  %vm468_vm10 = vcmp.ge.s32.totalorder %v409_v60, %v2186_v33  ;;  %vm479_vm12 = vmand %vm467_vm6, %vm475_vm7  ;;  %s1419_s25 = sshll.u32 %s1617_s6, 4  ;;  %s1420_s25 = int_to_ptr.vmem [resolvable:$false] %s1419_s25 }
 0x112   : > { %1063 = vmatpush3.bf16.msra.mxu0 %v1060_v19  ;;  %1033 = vmatprep.subr.bf16.mxu1 %v1032_v26  ;;  %v1080_v59 = vpack.c.bf16 %v460_v56, %v459_v55  ;;  %vm476_vm11 = vcmp.lt.s32.totalorder %v409_v60, %v2188_v34  ;;  %vm423_vm13 = vcmp.ge.s32.totalorder %v409_v60, %v2192_v36  ;;  %vm434_vm15 = vmand %vm422_vm8, %vm430_vm9  ;;  %p1417_p9 = pnand %p1416_p0, %p2434_p10  ;;  %s1421_s20 = scalar_lea.vmem %s1420_s25, 1024 }
 0x113   : > { %1065 = vmatprep.subr.bf16.mxu0 %v1064_v27  ;;  %vm431_vm14 = vcmp.lt.s32.totalorder %v409_v60, %v2194_v37  ;;  %vm480_vm0 = vmand %vm468_vm10, %vm476_vm11  ;;  %vm469_vm1 = vcmp.ge.s32.totalorder %v410_v61, %v2186_v33  ;;  %vm477_vm2 = vcmp.lt.s32.totalorder %v410_v61, %v2188_v34  ;;  %vm424_vm4 = vcmp.ge.s32.totalorder %v410_v61, %v2192_v36  ;;  %p1422_p2 = scmp.lt.s32.totalorder %s2233_s5, %s1420_s25  ;;  %p1423_p1 = scmp.lt.s32.totalorder %s1421_s20, %s1415_s26 }
 0x114   : > { %vm435_vm3 = vmand %vm423_vm13, %vm431_vm14  ;;  %vm432_vm5 = vcmp.lt.s32.totalorder %v410_v61, %v2194_v37  ;;  %p1418_p6 = pneg %p1417_p9 }
 0x115   : > { %1035 = vmatpush3.bf16.msra.mxu1 %v1032_v26  ;;  %vm481_vm6 = vmand %vm469_vm1, %vm477_vm2  ;;  %p1424_p4 = por %p1423_p1, %p1422_p2 }
 0x116   : > { %1067 = vmatpush3.bf16.msra.mxu0 %v1064_v27  ;;  %1037 = vmatprep.subr.bf16.mxu1 %v1036_v38  ;;  %vm436_vm7 = vmand %vm424_vm4, %vm432_vm5 }
 0x117   : > { %1069 = vmatprep.subr.bf16.mxu0 %v1068_v39  ;;  %p1425_p3 = pnand %p1424_p4, %p1418_p6 }
 0x119   : > { %1039 = vmatpush3.bf16.msra.mxu1 %v1036_v38 }
 0x11a   : > { %1071 = vmatpush3.bf16.msra.mxu0 %v1068_v39  ;;  %1041 = vmatprep.subr.bf16.mxu1 %v1040_v45 }
 0x11b   : > { %1073 = vmatprep.subr.bf16.mxu0 %v1072_v46 }
 0x11d   : > { %1043 = vmatpush3.bf16.msra.mxu1 %v1040_v45 }
 0x11e   : > { %1075 = vmatpush3.bf16.msra.mxu0 %v1072_v46  ;;  %1045 = vmatprep.subr.bf16.mxu1 %v1044_v51 }
 0x11f   : > { %1077 = vmatprep.subr.bf16.mxu0 %v1076_v52 }
 0x121   : > { %1047 = vmatpush3.bf16.msra.mxu1 %v1044_v51 }
 0x122   : > { %1079 = vmatpush3.bf16.msra.mxu0 %v1076_v52  ;;  %1049 = vmatprep.subr.bf16.mxu1 %v1048_v58 }
 0x123   : > { %1081 = vmatprep.subr.bf16.mxu0 %v1080_v59 }
 0x125   : > { %1051 = vmatpush3.bf16.msra.mxu1 %v1048_v58 }
 0x126   : > { %1083 = vmatpush3.bf16.msra.mxu0 %v1080_v59 }
 0x128   : > { %977 = vmatmul.mubr.msk.f32.vlgmr.msra.gmra.mrb[0].mxu1 %vm479_vm12, %v1616_v44 }
 0x129   : > { %1015 = vmatmul.mubr.msk.f32.vlgmr.msra.gmra.mrb[0].mxu0 %vm434_vm15, %v1616_v44  ;;  %979 = vmatprep.mubr.msk.f32.mxu1 %vm480_vm0, %v1616_v44 }
 0x12a   : > { %1017 = vmatprep.mubr.msk.f32.mxu0 %vm435_vm3, %v1616_v44 }
 0x12c   : > { %980 = vmatmul.mubr.msk.f32.gmra.mrb[2].mxu1 %vm481_vm6, %v1616_v44 }
 0x12d   : > { %1018 = vmatmul.mubr.msk.f32.gmra.mrb[2].mxu0 %vm436_vm7, %v1616_v44 }
 0x1fb   : > { %v978_v62 = vpop.f32.mrb[0].mxu1 }
 0x1fc   : > { %v1016_v63 = vpop.f32.mrb[0].mxu0  ;;  %v572_v0 = vpop.f32.mrb[1].mxu1 }
 0x1fd   : > { %v663_v1 = vadd.f32 %v1016_v63, %v978_v62  ;;  %v657_v2 = vpop.f32.mrb[1].mxu0 }
 0x1fe   : > { %v658_v3 = vadd.f32 %v657_v2, %v572_v0 }
 0x1ff   : > { %677 = vst [vmem:[%s391_s17 + $0x8] sm:$0xff] %v663_v1  ;;  %v981_v4 = vpop.f32.mrb[2].mxu1 }
 0x200   : > { %676 = vst [vmem:[%s391_s17] sm:$0xff] %v658_v3  ;;  %v1019_v5 = vpop.f32.mrb[2].mxu0  ;;  %v582_v6 = vpop.f32.mrb[3].mxu1 }
 0x201   : > { %v673_v7 = vadd.f32 %v1019_v5, %v981_v4  ;;  %v667_v8 = vpop.f32.mrb[3].mxu0 }
 0x202   : > { %v668_v9 = vadd.f32 %v667_v8, %v582_v6 }
 0x203   : > { %679 = vst [vmem:[%s391_s17 + $0x18] sm:$0xff] %v673_v7 }
 0x204   : > { %678 = vst [vmem:[%s391_s17 + $0x10] sm:$0xff] %v668_v9 }
 0x205   : > { %1428 = shalt.err (!%p1425_p3)
}
 0x206   : > { %s1429_s27 = scalar_lea.hbm %s2238_s12, 512  ;;  %s1433_s29 = scalar_lea.hbm %s2433_s23, 1024 }
 0x207   : > { %p1430_p7 = scmp.ne.s32.totalorder %s2238_s12, %s1429_s27  ;;  %p1434_p12 = scmp.lt.u32.totalorder %s2238_s12, %s2433_s23 }
 0x208   : > { %p1435_p8 = scmp.lt.u32.totalorder %s1433_s29, %s1429_s27  ;;  %p1437_p0 = scmp.lt.u32.totalorder %s1429_s27, %s2238_s12 }
 0x209   : > { %p1431_p5 = pnand %p1430_p7, %p2434_p10 }
 0x20a   : > { %p1436_p13 = por %p1435_p8, %p1434_p12 }
 0x20b   : > { %p1432_p11 = pneg %p1431_p5 }
 0x20c   : > { %p1438_p9 = por %p1437_p0, %p1436_p13 }
 0x20e   : > { %p1439_p6 = pnand %p1438_p9, %p1432_p11 }
 0x210   : > { %1442 = shalt.err (!%p1439_p6)
}
 0x211   : > { %s1618_s14 = smov 128   ;;  %s1619_s17 = smov 8  }
 0x212   : > { %1104 = dma.vmem_to_hbm [thread:$0]  (%p2434_p10), %s2233_s5, 512, %s2238_s12, %s2240_s13, %s1618_s14, %s1618_s14, %s1619_s17  }
 0x213 PF: > { %s2435_s2 = sld [smem:[#allocation27_spill]]  ;;  %s2436_s24 = sld [smem:[#allocation39_spill]] }
 0x214   : > { %p2438_p1 = scmp.ge.s32.totalorder %s1607_s19, 2 }
 0x219   : > { %s711_s16 = sand.u32 1, %s2435_s2   ;;  %p2437_p2 = scmp.ne.s32.totalorder %s2436_s24, 0 }
 0x21a   : > { %s712_s11 = scalar_lea.sflag [#allocation6], %s711_s16 }
 0x21b   : > { %p1128_p4 = pnand %p2438_p1, %p2437_p2 }
 0x21d   : > { %1534 = dma.done.wait (!%p1128_p4), %s712_s11, 512  }
 0x21e   : > { %1536 = vsyncadd (!%p1128_p4), %s712_s11, 4294966784  ;;  %s31_s19 = sadd.s32 1, %s1607_s19   ;;  %s2440_s28 = sld [smem:[#allocation28_spill]] }
 0x21f   : > { %p2270_p3 = scmp.ge.s32.totalorder %s31_s19, 4   ;;  %s2441_s29 = sld [smem:[#allocation29_spill]] }
 0x220   : > { %s2442_s5 = sld [smem:[#allocation37_spill]]  ;;  %s2443_s12 = smov %s1982_s30 }
 0x221   : > { %s2444_s11 = sld [smem:[#allocation31_spill]]  ;;  %s2445_s13 = sld [smem:[#allocation32_spill]] }
 0x222   : > { %s2446_s25 = sld [smem:[#allocation40_spill]]  ;;  %s2447_s20 = sld [smem:[#allocation33_spill]] }
 0x223   : > { %s2448_s16 = sld [smem:[#allocation42_spill]]  ;;  %s2449_s27 = sld [smem:[#allocation35_spill]] }
 0x224   : > { %s2451_s6 = smov %s1555_s0  ;;  %s2452_s0 = smov %s1559_s7 }
 0x225   : > { %s2453_s7 = smov %s2071_s4  ;;  %s2454_s8 = smov %s1567_s9 }
 0x226   : > { %s2450_s30 = smov %s2442_s5  ;;  %s2455_s9 = smov %s1571_s10 }
 0x227   : > { %s2456_s10 = smov %s2443_s12  ;;  %s2457_s12 = smov %s2445_s13 }
 0x228   : > { %s2458_s13 = smov %s2446_s25  ;;  %s2459_s14 = smov %s1591_s15 }
 0x229   : > { %s2460_s15 = smov %s2447_s20  ;;  %s2461_s17 = smov %s1603_s18 }
 0x22a   : > { %s2462_s18 = smov %s2449_s27  ;;  %30 = sbr.rel (!%p2270_p3) target bundleno = 29 (0x1d), region = 118 }
 0x231   :  { %717 = vsyncpa [#allocation5], 1 }
 0x232   :  { %719 = vsyncpa [#allocation5 + $0x1], 1 }
 0x233   :  { %720 = vsyncpa [#allocation8], 1 }
 0x234   :  { %722 = vsyncpa [#allocation8 + $0x1], 1 }
 0x235   :  { %723 = vsyncpa [#allocation11], 1 }
 0x236   :  { %725 = vsyncpa [#allocation11 + $0x1], 1 }
 0x237   :  { %726 = vsyncpa [#allocation6], 1 }
 0x238   :  { %728 = vsyncpa [#allocation6 + $0x1], 1 }

</bundles_post_ra>
